<compile_context>
chip_gen: v7x
topology: tpu7x:2x2x1
jax: 0.10.0
libtpu: 0.0.40
codegen_flags: <defaults>
</compile_context>

<pallas_src>
import functools

import numpy as np
import jax
import jax.numpy as jnp
from jax import lax
from jax.experimental import pallas as pl
from jax.experimental.pallas import tpu as pltpu


def _group_map(n_block):
    """(dh, dw) -> channel offset g inside each group of F*F output channels.

    Computed host-side by running the exact torch view/permute chain on an
    index plane, so the interleaved bit ordering of the chained squeezes is
    reproduced with zero chance of a bit-order mistake.
    """
    F = 2 ** n_block
    ref = np.arange(F * F, dtype=np.int64).reshape(1, 1, F, F)  # value = dh*F+dw
    for _ in range(n_block):
        b, c, h, w = ref.shape
        ref = ref.reshape(b, c, h // 2, 2, w // 2, 2)
        ref = ref.transpose(0, 1, 3, 5, 2, 4)
        ref = ref.reshape(b, c * 4, h // 2, w // 2)
    vals = ref.reshape(F * F)  # vals[g] = dh*F + dw
    g_of = np.zeros((F, F), np.int64)
    for g, v in enumerate(vals):
        g_of[v // F, v % F] = g
    return g_of


def _fused_squeeze_kernel(x_ref, s_ref, o_ref, *, F, Wp, Cb, g_of, precision):
    # x_ref: (1, Cb, Hb, F*W)   rows = hp, lanes = (dh, w) per plane (free view)
    # s_ref: (W, W)             combined 0/1 column-selection matrix
    # o_ref: (1, Cb, G, Hb, Wp) final layout (plane, group, h', w')
    W = F * Wp
    s = s_ref[...]
    for p in range(Cb):
        for dh in range(F):
            # Lane slice (free; W-aligned whenever W % 128 == 0): all rows with
            # h % F == dh of plane p, already de-interleaved by the input view.
            xr = x_ref[0, p, :, dh * W:(dh + 1) * W]              # (Hb, W)
            # One wide-N MXU matmul de-interleaves every column offset dw at
            # once: y[:, dw*Wp + wp] = xr[:, F*wp + dw].  Exact: 0/1 selection,
            # single non-zero term per accumulation, explicit precision.
            y = jnp.dot(xr, s, preferred_element_type=jnp.float32,
                        precision=precision)
            y = y.astype(o_ref.dtype)
            # Store the F dw-slabs immediately so nothing bigger than (Hb, W)
            # stays live (no VMEM spill of a block-sized temporary).
            for dw in range(F):
                g = g_of[dh][dw]
                o_ref[0, p, g, :, :] = y[:, dw * Wp:(dw + 1) * Wp]


def _pick_blocking(B, C, Hp, row_bytes, *, target_bytes=2 << 20, min_steps=8):
    """Choose (Cb, Hb): channel-block and row-block sizes.

    Constraints: Cb | C;  Hb | Hp and (Hb % 8 == 0 or Hb == Hp)  (layout rule
    on the second-to-last block dim).  Preference: reach >= min_steps grid
    steps (DMA pipelining + megacore sharding on v7x's 2 TCs), then the largest
    block <= target_bytes.  Real VMEM use is ~4x the block (input + output,
    double-buffered), so a 2 MiB target stays far under v7x's scoped VMEM.
    """
    hb_opts = [d for d in range(1, Hp + 1)
               if Hp % d == 0 and (d % 8 == 0 or d == Hp)]
    cb_opts = [d for d in range(1, C + 1) if C % d == 0]
    cands = [(cb, hb) for cb in cb_opts for hb in hb_opts]
    blk = lambda c: c[0] * c[1] * row_bytes
    steps = lambda c: B * (C // c[0]) * (Hp // c[1])
    feasible = [c for c in cands if blk(c) <= target_bytes]
    if not feasible:              # even the smallest legal block exceeds target
        feasible = [min(cands, key=blk)]
    best = max(feasible, key=lambda c: (min(steps(c), min_steps), blk(c)))
    return best


def glow_squeeze_chain(x, n_block):
    """All n_block Block-squeezes fused into a single Pallas pass (NCHW)."""
    if n_block == 0:
        return x
    B, C, H, W = x.shape
    F = 2 ** n_block
    assert H % F == 0 and W % F == 0, "H, W must be divisible by 2**n_block"
    Hp, Wp, G = H // F, W // F, F * F

    g_of = tuple(map(tuple, _group_map(n_block).tolist()))

    # Combined column-selection matrix: input column F*wp + dw -> output column
    # dw*Wp + wp (all dw handled by one wide-N matmul).  Exact for float inputs.
    s_np = np.zeros((W, W), np.float32)
    for dw in range(F):
        for wp in range(Wp):
            s_np[F * wp + dw, dw * Wp + wp] = 1.0
    s = jnp.asarray(s_np).astype(x.dtype)

    itemsize = jnp.dtype(x.dtype).itemsize
    row_bytes = F * W * itemsize
    Cb, Hb = _pick_blocking(B, C, Hp, row_bytes)

    # Free views only (NCHW is row-major contiguous): no extra HBM traffic.
    #   input : (B, C, Hp, F*W)   lanes ordered (dh, w)
    #   output: (B, C, G, Hp, Wp) -> free view back to (B, C*G, Hp, Wp)
    x4 = x.reshape(B, C, Hp, F * W)

    precision = (lax.Precision.HIGHEST if x.dtype == jnp.float32
                 else lax.Precision.DEFAULT)
    kernel = functools.partial(_fused_squeeze_kernel,
                               F=F, Wp=Wp, Cb=Cb, g_of=g_of, precision=precision)

    # VMEM budget: in + out blocks double-buffered (+ the small constant s).
    blk_bytes = Cb * Hb * F * W * itemsize
    s_bytes = W * W * itemsize
    vmem_need = 4 * blk_bytes + 2 * s_bytes + (4 << 20)
    vmem_limit = int(min(64 << 20, max(32 << 20, vmem_need)))

    out = pl.pallas_call(
        kernel,
        out_shape=jax.ShapeDtypeStruct((B, C, G, Hp, Wp), x.dtype),
        grid=(B, C // Cb, Hp // Hb),
        in_specs=[
            pl.BlockSpec((1, Cb, Hb, F * W), lambda b, c, r: (b, c, r, 0)),
            pl.BlockSpec((W, W), lambda b, c, r: (0, 0)),
        ],
        out_specs=pl.BlockSpec((1, Cb, G, Hb, Wp),
                               lambda b, c, r: (b, c, 0, r, 0)),
        compiler_params=pltpu.CompilerParams(
            dimension_semantics=("parallel", "parallel", "parallel"),
            vmem_limit_bytes=vmem_limit),
    )(x4, s)

    # Free view back to the module's output layout (B, C*4**n, H/2**n, W/2**n).
    return out.reshape(B, C * G, Hp, Wp)


class GlowPallas:
    """JAX/Pallas port of Glow.forward (forward=True).

    Only the provided code (Glow + Block) is reproduced.  With n_flow=0,
    n_trans=0 and style=None the forward pass is reproduced exactly, as one
    fused Pallas space-to-depth pass over the whole block chain.
    """

    def __init__(self, in_channel, n_flow, n_block, affine=True, conv_lu=True,
                 n_trans=0, max_sample=256 * 256):
        self.n_block = n_block
        self.n_flow = n_flow
        self.n_trans = n_trans
        # TODO(synk): Flow / TransitionFlow class definitions were not provided;
        # their per-block application is skipped (exact only for n_flow=n_trans=0).
        # TODO(synk): AdaAttN class definition was not provided; the style branch
        # (style is not None) is not implemented.

    def forward(self, x, forward=True, style=None):
        if not forward:
            raise NotImplementedError("only the forward direction is implemented")
        if style is not None:
            raise NotImplementedError("AdaAttN style path not available (see TODO)")
        if self.n_flow != 0 or self.n_trans != 0:
            raise NotImplementedError("Flow/TransitionFlow not available (see TODO)")
        return glow_squeeze_chain(x, self.n_block)


def _squeeze_chain_reference(x, n_block):
    """Pure-jnp reference of the Block squeeze chain (mirrors the torch views)."""
    ref = x
    for _ in range(n_block):
        b, c, h, w = ref.shape
        ref = ref.reshape(b, c, h // 2, 2, w // 2, 2)
        ref = jnp.transpose(ref, (0, 1, 3, 5, 2, 4))
        ref = ref.reshape(b, c * 4, h // 2, w // 2)
    return ref


if __name__ == "__main__":
    key = jax.random.PRNGKey(0)
    B, C, H, W = 2, 3, 16, 16
    x = jax.random.normal(key, (B, C, H, W), dtype=jnp.float32)

    # Main case: n_block = 2 (fused chain, factor 4).
    n_block = 2
    model = GlowPallas(in_channel=C, n_flow=0, n_block=n_block,
                       affine=True, conv_lu=True, n_trans=0)
    z = jax.block_until_ready(model.forward(x, forward=True, style=None))
    expected_shape = (B, C * 4 ** n_block, H // 2 ** n_block, W // 2 ** n_block)
    assert z.shape == expected_shape, (z.shape, expected_shape)
    ref = _squeeze_chain_reference(x, n_block)
    assert np.allclose(np.asarray(z), np.asarray(ref), atol=1e-6)

    # Also exercise the n_block = 1 path.
    z1 = jax.block_until_ready(glow_squeeze_chain(x, 1))
    ref1 = _squeeze_chain_reference(x, 1)
    assert z1.shape == (B, 4 * C, H // 2, W // 2)
    assert np.allclose(np.asarray(z1), np.asarray(ref1), atol=1e-6)

    print("KERNEL_OK")
</pallas_src>

<mosaic_0001>
module attributes {stable_mosaic.version = 11 : i64} {
  func.func @_fused_squeeze_kernel(%arg0: i32, %arg1: i32, %arg2: i32, %arg3: memref<1x1x4x64xf32, #tpu.memory_space<vmem>>, %arg4: memref<16x16xf32, #tpu.memory_space<vmem>>, %arg5: memref<1x1x16x4x4xf32, #tpu.memory_space<vmem>>) attributes {dimension_semantics = [#tpu.dimension_semantics<parallel>, #tpu.dimension_semantics<parallel>, #tpu.dimension_semantics<parallel>], iteration_bounds = array<i64: 2, 3, 1>, scalar_prefetch = 0 : i64, scratch_operands = 0 : i64, tpu.core_type = #tpu.core_type<tc>, window_params = [{transform_indices = @transform_0, window_bounds = array<i64: 1, 1, 4, 64>}, {pipeline_mode = #tpu.pipeline_mode<synchronous>, transform_indices = @transform_1, window_bounds = array<i64: 16, 16>}, {transform_indices = @transform_2, window_bounds = array<i64: 1, 1, 16, 4, 4>}]} {
    %c0 = arith.constant 0 : index
    %c0_0 = arith.constant 0 : index
    %0 = vector.load %arg4[%c0, %c0_0] : memref<16x16xf32, #tpu.memory_space<vmem>>, vector<16x16xf32>
    %c0_1 = arith.constant 0 : index
    %c0_2 = arith.constant 0 : index
    %c0_3 = arith.constant 0 : index
    %c0_4 = arith.constant 0 : index
    %1 = vector.load %arg3[%c0_1, %c0_2, %c0_3, %c0_4] : memref<1x1x4x64xf32, #tpu.memory_space<vmem>>, vector<1x1x4x16xf32>
    %2 = vector.shape_cast %1 : vector<1x1x4x16xf32> to vector<4x16xf32>
    %cst = arith.constant dense<0.000000e+00> : vector<4x16xf32>
    %3 = tpu.matmul %2, %0, %cst {dimension_numbers = #tpu.dot_dimension_numbers<[1], [0], [0], [1], [0, 0, 1, 1], [], []>, precision = #tpu.contract_precision<fp32>} : vector<4x16xf32>, vector<16x16xf32>, vector<4x16xf32> -> vector<4x16xf32>
    %4 = vector.extract_strided_slice %3 {offsets = [0, 0], sizes = [4, 4], strides = [1, 1]} : vector<4x16xf32> to vector<4x4xf32>
    %c0_5 = arith.constant 0 : index
    %c0_6 = arith.constant 0 : index
    %c0_7 = arith.constant 0 : index
    %c0_8 = arith.constant 0 : index
    %c0_9 = arith.constant 0 : index
    %5 = vector.load %arg5[%c0_5, %c0_6, %c0_7, %c0_8, %c0_9] : memref<1x1x16x4x4xf32, #tpu.memory_space<vmem>>, vector<1x1x1x4x4xf32>
    %6 = vector.shape_cast %5 : vector<1x1x1x4x4xf32> to vector<4x4xf32>
    %7 = vector.shape_cast %4 : vector<4x4xf32> to vector<1x1x1x4x4xf32>
    tpu.vector_store %arg5[%c0_5, %c0_6, %c0_7, %c0_8, %c0_9], %7 {strides = array<i32>} : memref<1x1x16x4x4xf32, #tpu.memory_space<vmem>>, vector<1x1x1x4x4xf32>,
    %8 = vector.extract_strided_slice %3 {offsets = [0, 4], sizes = [4, 4], strides = [1, 1]} : vector<4x16xf32> to vector<4x4xf32>
    %c0_10 = arith.constant 0 : index
    %c0_11 = arith.constant 0 : index
    %c4 = arith.constant 4 : index
    %c0_12 = arith.constant 0 : index
    %c0_13 = arith.constant 0 : index
    %9 = vector.load %arg5[%c0_10, %c0_11, %c4, %c0_12, %c0_13] : memref<1x1x16x4x4xf32, #tpu.memory_space<vmem>>, vector<1x1x1x4x4xf32>
    %10 = vector.shape_cast %9 : vector<1x1x1x4x4xf32> to vector<4x4xf32>
    %11 = vector.shape_cast %8 : vector<4x4xf32> to vector<1x1x1x4x4xf32>
    tpu.vector_store %arg5[%c0_10, %c0_11, %c4, %c0_12, %c0_13], %11 {strides = array<i32>} : memref<1x1x16x4x4xf32, #tpu.memory_space<vmem>>, vector<1x1x1x4x4xf32>,
    %12 = vector.extract_strided_slice %3 {offsets = [0, 8], sizes = [4, 4], strides = [1, 1]} : vector<4x16xf32> to vector<4x4xf32>
    %c0_14 = arith.constant 0 : index
    %c0_15 = arith.constant 0 : index
    %c1 = arith.constant 1 : index
    %c0_16 = arith.constant 0 : index
    %c0_17 = arith.constant 0 : index
    %13 = vector.load %arg5[%c0_14, %c0_15, %c1, %c0_16, %c0_17] : memref<1x1x16x4x4xf32, #tpu.memory_space<vmem>>, vector<1x1x1x4x4xf32>
    %14 = vector.shape_cast %13 : vector<1x1x1x4x4xf32> to vector<4x4xf32>
    %15 = vector.shape_cast %12 : vector<4x4xf32> to vector<1x1x1x4x4xf32>
    tpu.vector_store %arg5[%c0_14, %c0_15, %c1, %c0_16, %c0_17], %15 {strides = array<i32>} : memref<1x1x16x4x4xf32, #tpu.memory_space<vmem>>, vector<1x1x1x4x4xf32>,
    %16 = vector.extract_strided_slice %3 {offsets = [0, 12], sizes = [4, 4], strides = [1, 1]} : vector<4x16xf32> to vector<4x4xf32>
    %c0_18 = arith.constant 0 : index
    %c0_19 = arith.constant 0 : index
    %c5 = arith.constant 5 : index
    %c0_20 = arith.constant 0 : index
    %c0_21 = arith.constant 0 : index
    %17 = vector.load %arg5[%c0_18, %c0_19, %c5, %c0_20, %c0_21] : memref<1x1x16x4x4xf32, #tpu.memory_space<vmem>>, vector<1x1x1x4x4xf32>
    %18 = vector.shape_cast %17 : vector<1x1x1x4x4xf32> to vector<4x4xf32>
    %19 = vector.shape_cast %16 : vector<4x4xf32> to vector<1x1x1x4x4xf32>
    tpu.vector_store %arg5[%c0_18, %c0_19, %c5, %c0_20, %c0_21], %19 {strides = array<i32>} : memref<1x1x16x4x4xf32, #tpu.memory_space<vmem>>, vector<1x1x1x4x4xf32>,
    %c0_22 = arith.constant 0 : index
    %c0_23 = arith.constant 0 : index
    %c0_24 = arith.constant 0 : index
    %c16 = arith.constant 16 : index
    %20 = vector.load %arg3[%c0_22, %c0_23, %c0_24, %c16] : memref<1x1x4x64xf32, #tpu.memory_space<vmem>>, vector<1x1x4x16xf32>
    %21 = vector.shape_cast %20 : vector<1x1x4x16xf32> to vector<4x16xf32>
    %cst_25 = arith.constant dense<0.000000e+00> : vector<4x16xf32>
    %22 = tpu.matmul %21, %0, %cst_25 {dimension_numbers = #tpu.dot_dimension_numbers<[1], [0], [0], [1], [0, 0, 1, 1], [], []>, precision = #tpu.contract_precision<fp32>} : vector<4x16xf32>, vector<16x16xf32>, vector<4x16xf32> -> vector<4x16xf32>
    %23 = vector.extract_strided_slice %22 {offsets = [0, 0], sizes = [4, 4], strides = [1, 1]} : vector<4x16xf32> to vector<4x4xf32>
    %c0_26 = arith.constant 0 : index
    %c0_27 = arith.constant 0 : index
    %c8 = arith.constant 8 : index
    %c0_28 = arith.constant 0 : index
    %c0_29 = arith.constant 0 : index
    %24 = vector.load %arg5[%c0_26, %c0_27, %c8, %c0_28, %c0_29] : memref<1x1x16x4x4xf32, #tpu.memory_space<vmem>>, vector<1x1x1x4x4xf32>
    %25 = vector.shape_cast %24 : vector<1x1x1x4x4xf32> to vector<4x4xf32>
    %26 = vector.shape_cast %23 : vector<4x4xf32> to vector<1x1x1x4x4xf32>
    tpu.vector_store %arg5[%c0_26, %c0_27, %c8, %c0_28, %c0_29], %26 {strides = array<i32>} : memref<1x1x16x4x4xf32, #tpu.memory_space<vmem>>, vector<1x1x1x4x4xf32>,
    %27 = vector.extract_strided_slice %22 {offsets = [0, 4], sizes = [4, 4], strides = [1, 1]} : vector<4x16xf32> to vector<4x4xf32>
    %c0_30 = arith.constant 0 : index
    %c0_31 = arith.constant 0 : index
    %c12 = arith.constant 12 : index
    %c0_32 = arith.constant 0 : index
    %c0_33 = arith.constant 0 : index
    %28 = vector.load %arg5[%c0_30, %c0_31, %c12, %c0_32, %c0_33] : memref<1x1x16x4x4xf32, #tpu.memory_space<vmem>>, vector<1x1x1x4x4xf32>
    %29 = vector.shape_cast %28 : vector<1x1x1x4x4xf32> to vector<4x4xf32>
    %30 = vector.shape_cast %27 : vector<4x4xf32> to vector<1x1x1x4x4xf32>
    tpu.vector_store %arg5[%c0_30, %c0_31, %c12, %c0_32, %c0_33], %30 {strides = array<i32>} : memref<1x1x16x4x4xf32, #tpu.memory_space<vmem>>, vector<1x1x1x4x4xf32>,
    %31 = vector.extract_strided_slice %22 {offsets = [0, 8], sizes = [4, 4], strides = [1, 1]} : vector<4x16xf32> to vector<4x4xf32>
    %c0_34 = arith.constant 0 : index
    %c0_35 = arith.constant 0 : index
    %c9 = arith.constant 9 : index
    %c0_36 = arith.constant 0 : index
    %c0_37 = arith.constant 0 : index
    %32 = vector.load %arg5[%c0_34, %c0_35, %c9, %c0_36, %c0_37] : memref<1x1x16x4x4xf32, #tpu.memory_space<vmem>>, vector<1x1x1x4x4xf32>
    %33 = vector.shape_cast %32 : vector<1x1x1x4x4xf32> to vector<4x4xf32>
    %34 = vector.shape_cast %31 : vector<4x4xf32> to vector<1x1x1x4x4xf32>
    tpu.vector_store %arg5[%c0_34, %c0_35, %c9, %c0_36, %c0_37], %34 {strides = array<i32>} : memref<1x1x16x4x4xf32, #tpu.memory_space<vmem>>, vector<1x1x1x4x4xf32>,
    %35 = vector.extract_strided_slice %22 {offsets = [0, 12], sizes = [4, 4], strides = [1, 1]} : vector<4x16xf32> to vector<4x4xf32>
    %c0_38 = arith.constant 0 : index
    %c0_39 = arith.constant 0 : index
    %c13 = arith.constant 13 : index
    %c0_40 = arith.constant 0 : index
    %c0_41 = arith.constant 0 : index
    %36 = vector.load %arg5[%c0_38, %c0_39, %c13, %c0_40, %c0_41] : memref<1x1x16x4x4xf32, #tpu.memory_space<vmem>>, vector<1x1x1x4x4xf32>
    %37 = vector.shape_cast %36 : vector<1x1x1x4x4xf32> to vector<4x4xf32>
    %38 = vector.shape_cast %35 : vector<4x4xf32> to vector<1x1x1x4x4xf32>
    tpu.vector_store %arg5[%c0_38, %c0_39, %c13, %c0_40, %c0_41], %38 {strides = array<i32>} : memref<1x1x16x4x4xf32, #tpu.memory_space<vmem>>, vector<1x1x1x4x4xf32>,
    %c0_42 = arith.constant 0 : index
    %c0_43 = arith.constant 0 : index
    %c0_44 = arith.constant 0 : index
    %c32 = arith.constant 32 : index
    %39 = vector.load %arg3[%c0_42, %c0_43, %c0_44, %c32] : memref<1x1x4x64xf32, #tpu.memory_space<vmem>>, vector<1x1x4x16xf32>
    %40 = vector.shape_cast %39 : vector<1x1x4x16xf32> to vector<4x16xf32>
    %cst_45 = arith.constant dense<0.000000e+00> : vector<4x16xf32>
    %41 = tpu.matmul %40, %0, %cst_45 {dimension_numbers = #tpu.dot_dimension_numbers<[1], [0], [0], [1], [0, 0, 1, 1], [], []>, precision = #tpu.contract_precision<fp32>} : vector<4x16xf32>, vector<16x16xf32>, vector<4x16xf32> -> vector<4x16xf32>
    %42 = vector.extract_strided_slice %41 {offsets = [0, 0], sizes = [4, 4], strides = [1, 1]} : vector<4x16xf32> to vector<4x4xf32>
    %c0_46 = arith.constant 0 : index
    %c0_47 = arith.constant 0 : index
    %c2 = arith.constant 2 : index
    %c0_48 = arith.constant 0 : index
    %c0_49 = arith.constant 0 : index
    %43 = vector.load %arg5[%c0_46, %c0_47, %c2, %c0_48, %c0_49] : memref<1x1x16x4x4xf32, #tpu.memory_space<vmem>>, vector<1x1x1x4x4xf32>
    %44 = vector.shape_cast %43 : vector<1x1x1x4x4xf32> to vector<4x4xf32>
    %45 = vector.shape_cast %42 : vector<4x4xf32> to vector<1x1x1x4x4xf32>
    tpu.vector_store %arg5[%c0_46, %c0_47, %c2, %c0_48, %c0_49], %45 {strides = array<i32>} : memref<1x1x16x4x4xf32, #tpu.memory_space<vmem>>, vector<1x1x1x4x4xf32>,
    %46 = vector.extract_strided_slice %41 {offsets = [0, 4], sizes = [4, 4], strides = [1, 1]} : vector<4x16xf32> to vector<4x4xf32>
    %c0_50 = arith.constant 0 : index
    %c0_51 = arith.constant 0 : index
    %c6 = arith.constant 6 : index
    %c0_52 = arith.constant 0 : index
    %c0_53 = arith.constant 0 : index
    %47 = vector.load %arg5[%c0_50, %c0_51, %c6, %c0_52, %c0_53] : memref<1x1x16x4x4xf32, #tpu.memory_space<vmem>>, vector<1x1x1x4x4xf32>
    %48 = vector.shape_cast %47 : vector<1x1x1x4x4xf32> to vector<4x4xf32>
    %49 = vector.shape_cast %46 : vector<4x4xf32> to vector<1x1x1x4x4xf32>
    tpu.vector_store %arg5[%c0_50, %c0_51, %c6, %c0_52, %c0_53], %49 {strides = array<i32>} : memref<1x1x16x4x4xf32, #tpu.memory_space<vmem>>, vector<1x1x1x4x4xf32>,
    %50 = vector.extract_strided_slice %41 {offsets = [0, 8], sizes = [4, 4], strides = [1, 1]} : vector<4x16xf32> to vector<4x4xf32>
    %c0_54 = arith.constant 0 : index
    %c0_55 = arith.constant 0 : index
    %c3 = arith.constant 3 : index
    %c0_56 = arith.constant 0 : index
    %c0_57 = arith.constant 0 : index
    %51 = vector.load %arg5[%c0_54, %c0_55, %c3, %c0_56, %c0_57] : memref<1x1x16x4x4xf32, #tpu.memory_space<vmem>>, vector<1x1x1x4x4xf32>
    %52 = vector.shape_cast %51 : vector<1x1x1x4x4xf32> to vector<4x4xf32>
    %53 = vector.shape_cast %50 : vector<4x4xf32> to vector<1x1x1x4x4xf32>
    tpu.vector_store %arg5[%c0_54, %c0_55, %c3, %c0_56, %c0_57], %53 {strides = array<i32>} : memref<1x1x16x4x4xf32, #tpu.memory_space<vmem>>, vector<1x1x1x4x4xf32>,
    %54 = vector.extract_strided_slice %41 {offsets = [0, 12], sizes = [4, 4], strides = [1, 1]} : vector<4x16xf32> to vector<4x4xf32>
    %c0_58 = arith.constant 0 : index
    %c0_59 = arith.constant 0 : index
    %c7 = arith.constant 7 : index
    %c0_60 = arith.constant 0 : index
    %c0_61 = arith.constant 0 : index
    %55 = vector.load %arg5[%c0_58, %c0_59, %c7, %c0_60, %c0_61] : memref<1x1x16x4x4xf32, #tpu.memory_space<vmem>>, vector<1x1x1x4x4xf32>
    %56 = vector.shape_cast %55 : vector<1x1x1x4x4xf32> to vector<4x4xf32>
    %57 = vector.shape_cast %54 : vector<4x4xf32> to vector<1x1x1x4x4xf32>
    tpu.vector_store %arg5[%c0_58, %c0_59, %c7, %c0_60, %c0_61], %57 {strides = array<i32>} : memref<1x1x16x4x4xf32, #tpu.memory_space<vmem>>, vector<1x1x1x4x4xf32>,
    %c0_62 = arith.constant 0 : index
    %c0_63 = arith.constant 0 : index
    %c0_64 = arith.constant 0 : index
    %c48 = arith.constant 48 : index
    %58 = vector.load %arg3[%c0_62, %c0_63, %c0_64, %c48] : memref<1x1x4x64xf32, #tpu.memory_space<vmem>>, vector<1x1x4x16xf32>
    %59 = vector.shape_cast %58 : vector<1x1x4x16xf32> to vector<4x16xf32>
    %cst_65 = arith.constant dense<0.000000e+00> : vector<4x16xf32>
    %60 = tpu.matmul %59, %0, %cst_65 {dimension_numbers = #tpu.dot_dimension_numbers<[1], [0], [0], [1], [0, 0, 1, 1], [], []>, precision = #tpu.contract_precision<fp32>} : vector<4x16xf32>, vector<16x16xf32>, vector<4x16xf32> -> vector<4x16xf32>
    %61 = vector.extract_strided_slice %60 {offsets = [0, 0], sizes = [4, 4], strides = [1, 1]} : vector<4x16xf32> to vector<4x4xf32>
    %c0_66 = arith.constant 0 : index
    %c0_67 = arith.constant 0 : index
    %c10 = arith.constant 10 : index
    %c0_68 = arith.constant 0 : index
    %c0_69 = arith.constant 0 : index
    %62 = vector.load %arg5[%c0_66, %c0_67, %c10, %c0_68, %c0_69] : memref<1x1x16x4x4xf32, #tpu.memory_space<vmem>>, vector<1x1x1x4x4xf32>
    %63 = vector.shape_cast %62 : vector<1x1x1x4x4xf32> to vector<4x4xf32>
    %64 = vector.shape_cast %61 : vector<4x4xf32> to vector<1x1x1x4x4xf32>
    tpu.vector_store %arg5[%c0_66, %c0_67, %c10, %c0_68, %c0_69], %64 {strides = array<i32>} : memref<1x1x16x4x4xf32, #tpu.memory_space<vmem>>, vector<1x1x1x4x4xf32>,
    %65 = vector.extract_strided_slice %60 {offsets = [0, 4], sizes = [4, 4], strides = [1, 1]} : vector<4x16xf32> to vector<4x4xf32>
    %c0_70 = arith.constant 0 : index
    %c0_71 = arith.constant 0 : index
    %c14 = arith.constant 14 : index
    %c0_72 = arith.constant 0 : index
    %c0_73 = arith.constant 0 : index
    %66 = vector.load %arg5[%c0_70, %c0_71, %c14, %c0_72, %c0_73] : memref<1x1x16x4x4xf32, #tpu.memory_space<vmem>>, vector<1x1x1x4x4xf32>
    %67 = vector.shape_cast %66 : vector<1x1x1x4x4xf32> to vector<4x4xf32>
    %68 = vector.shape_cast %65 : vector<4x4xf32> to vector<1x1x1x4x4xf32>
    tpu.vector_store %arg5[%c0_70, %c0_71, %c14, %c0_72, %c0_73], %68 {strides = array<i32>} : memref<1x1x16x4x4xf32, #tpu.memory_space<vmem>>, vector<1x1x1x4x4xf32>,
    %69 = vector.extract_strided_slice %60 {offsets = [0, 8], sizes = [4, 4], strides = [1, 1]} : vector<4x16xf32> to vector<4x4xf32>
    %c0_74 = arith.constant 0 : index
    %c0_75 = arith.constant 0 : index
    %c11 = arith.constant 11 : index
    %c0_76 = arith.constant 0 : index
    %c0_77 = arith.constant 0 : index
    %70 = vector.load %arg5[%c0_74, %c0_75, %c11, %c0_76, %c0_77] : memref<1x1x16x4x4xf32, #tpu.memory_space<vmem>>, vector<1x1x1x4x4xf32>
    %71 = vector.shape_cast %70 : vector<1x1x1x4x4xf32> to vector<4x4xf32>
    %72 = vector.shape_cast %69 : vector<4x4xf32> to vector<1x1x1x4x4xf32>
    tpu.vector_store %arg5[%c0_74, %c0_75, %c11, %c0_76, %c0_77], %72 {strides = array<i32>} : memref<1x1x16x4x4xf32, #tpu.memory_space<vmem>>, vector<1x1x1x4x4xf32>,
    %73 = vector.extract_strided_slice %60 {offsets = [0, 12], sizes = [4, 4], strides = [1, 1]} : vector<4x16xf32> to vector<4x4xf32>
    %c0_78 = arith.constant 0 : index
    %c0_79 = arith.constant 0 : index
    %c15 = arith.constant 15 : index
    %c0_80 = arith.constant 0 : index
    %c0_81 = arith.constant 0 : index
    %74 = vector.load %arg5[%c0_78, %c0_79, %c15, %c0_80, %c0_81] : memref<1x1x16x4x4xf32, #tpu.memory_space<vmem>>, vector<1x1x1x4x4xf32>
    %75 = vector.shape_cast %74 : vector<1x1x1x4x4xf32> to vector<4x4xf32>
    %76 = vector.shape_cast %73 : vector<4x4xf32> to vector<1x1x1x4x4xf32>
    tpu.vector_store %arg5[%c0_78, %c0_79, %c15, %c0_80, %c0_81], %76 {strides = array<i32>} : memref<1x1x16x4x4xf32, #tpu.memory_space<vmem>>, vector<1x1x1x4x4xf32>,
    return
  }
  func.func @transform_0(%arg0: i32, %arg1: i32, %arg2: i32) -> (i32, i32, i32, i32) {
    %c0_i32 = arith.constant 0 : i32
    %c0_i32_0 = arith.constant 0 : i32
    return %arg0, %arg1, %arg2, %c0_i32 : i32, i32, i32, i32
  }
  func.func @transform_1(%arg0: i32, %arg1: i32, %arg2: i32) -> (i32, i32) {
    %c0_i32 = arith.constant 0 : i32
    %c0_i32_0 = arith.constant 0 : i32
    %c0_i32_1 = arith.constant 0 : i32
    return %c0_i32, %c0_i32_0 : i32, i32
  }
  func.func @transform_2(%arg0: i32, %arg1: i32, %arg2: i32) -> (i32, i32, i32, i32, i32) {
    %c0_i32 = arith.constant 0 : i32
    %c0_i32_0 = arith.constant 0 : i32
    %c0_i32_1 = arith.constant 0 : i32
    return %arg0, %arg1, %c0_i32, %arg2, %c0_i32_0 : i32, i32, i32, i32, i32
  }
}

</mosaic_0001>

<bundles_post_ra>
// kernel: tpu_custom_call.1
= control target key start
LH: loop header
LB: loop body
LE: loop exit
PB: predicated region body
PF: predicated region fallthrough
CT: control target
= control target key end

     0   :  { %7 = vsyncpa [#allocation3], 0  ;;  %s3241_s0 = inlined_call_operand.hbm [shape: f32[2,3,4,64], index: 0, kind: input, shape index: {}]   ;;  %s3242_s1 = inlined_call_operand.hbm [shape: f32[16,16], index: 1, kind: input, shape index: {}]   ;;  %s3243_s2 = inlined_call_operand.vmem [shape: f32[2,3,16,4,4], index: 2, kind: output, shape index: {}]  }
   0x1   :  { %9 = vsyncpa [#allocation3 + $0x1], 0 }
   0x2   :  { %10 = vsyncpa [#allocation5], 0  ;;  %s2911_s9 = smov 0   ;;  %s2913_s10 = smov 0  }
   0x3   :  { %s2915_s11 = smov 0   ;;  %s2917_s12 = smov 0  }
   0x4   :  { %s2919_s13 = smov 0   ;;  %s2921_s14 = smov 0  }
   0x5   :  { %s2923_s15 = smov 0   ;;  %s2925_s16 = smov 0  }
   0x6 LB: > { %s2277_s17 = sadd.s32 4294967295, %s2881_s16   ;;  %p59_p0 = scmp.ne.s32.totalorder %s2857_s10, %s2853_s9  ;;  %s2881_s16 = sphi %s2925_s16, %s16_s16   ;;  %s2877_s15 = sphi %s2923_s15, %s3264_s15   ;;  %s2873_s14 = sphi %s2921_s14, %s3263_s14   ;;  %s2869_s13 = sphi %s2919_s13, %s3262_s13   ;;  %s2865_s12 = sphi %s2917_s12, %s3261_s12   ;;  %s2861_s11 = sphi %s2915_s11, %s3260_s11   ;;  %s2857_s10 = sphi %s2913_s10, %s3259_s10   ;;  %s2853_s9 = sphi %s2911_s9, %s3258_s9  }
   0x7   : > { %p2951_p1 = scmp.eq.s32.totalorder %s2277_s17, 0  ;;  %p2279_p2 = scmp.ge.s32.totalorder %s2881_s16, 1 }
   0x8   : > { %p121_p3 = scmp.lt.s32.totalorder %s2881_s16, 7  ;;  %s2883_s21 = smov [#allocation4]  }
   0x9   : > { %s3248_s18 = scalar_select %p2951_p1, 1, 0 }
   0xa   : > { %p2959_p4 = por %p2951_p1, %p59_p0  ;;  %p2963_p5 = pnand %p2279_p2, %p121_p3 }
   0xb   : > { %s133_s22 = sshll.u32 %s2883_s21, 4  ;;  %s2753_s26 = scalar_lea.hbm %s3242_s1, 256  ;;  %s134_s22 = int_to_ptr.vmem [resolvable:$true] %s133_s22 }
   0xc   : > { %s3249_s19 = scalar_select %p2959_p4, 1, 0 }
   0xd   : > { %s3250_s20 = scalar_select %p2963_p5, 1, 0 }
   0xe   : > { %p2666_p6 = pneg %p2963_p5  ;;  %p2754_p8 = scmp.ne.s32.totalorder %s3242_s1, %s2753_s26 }
   0xf   : > { %p2760_p12 = scmp.lt.u32.totalorder %s2753_s26, %s3242_s1 }
  0x10   : > { %p2971_p7 = pnand %p2666_p6, %p2951_p1 }
  0x12   : > { %p2755_p9 = pneg %p2971_p7 }
  0x14   : > { %p2756_p10 = pnand %p2755_p9, %p2754_p8 }
  0x16   : > { %p2757_p11 = pneg %p2756_p10 }
  0x18   : > { %p2762_p13 = pnand %p2760_p12, %p2757_p11 }
  0x1a   : > { %2765 = shalt.err (!%p2762_p13)
}
  0x1b   : > { %s2766_s3 = scalar_lea.vmem %s134_s22, 256  ;;  %p2774_p6 = scmp.lt.s32.totalorder %s134_s22, %s134_s22 }
  0x1c   : > { %p2767_p0 = scmp.ne.s32.totalorder %s134_s22, %s2766_s3  ;;  %p2775_p1 = scmp.lt.s32.totalorder %s2766_s3, %s2766_s3 }
  0x1e   : > { %p2769_p2 = pnand %p2767_p0, %p2755_p9  ;;  %p2776_p4 = por %p2775_p1, %p2774_p6 }
  0x20   : > { %p2770_p3 = pneg %p2769_p2 }
  0x22   : > { %p2777_p5 = pnand %p2776_p4, %p2770_p3 }
  0x24   : > { %2780 = shalt.err (!%p2777_p5)
}
  0x25   : > { %s2884_s4 = smov 128   ;;  %s2885_s5 = smov 8  }
  0x26   : > { %2669 = dma.hbm_to_vmem [thread:$0]  (!%p2971_p7), %s3242_s1, 256, %s134_s22, [#allocation5], %s2884_s4, %s2884_s4, %s2885_s5  }
  0x27   : > { %s31_s8 = sadd.s32 1, %s2873_s14  ;;  %s35_s9 = sadd.s32 1, %s2877_s15 }
  0x28   : > { %p33_p1 = scmp.ge.s32.totalorder %s31_s8, 3  ;;  %s46_s17 = sadd.s32 1, %s2861_s11 }
  0x29   : > { %p53_p4 = scmp.ne.s32.totalorder %s2861_s11, %s2857_s10  ;;  %p54_p5 = scmp.eq.s32.totalorder %s2881_s16, 0 }
  0x2a   : > { %s3266_s8 = smov (%p33_p1, %s31_s8), 0  ;;  %s3268_s9 = smov (!%p33_p1, %s35_s9), %s2877_s15 }
  0x2b   : > { %s40_s21 = ssub.s32 %s2873_s14, %s3266_s8  ;;  %p37_p8 = scmp.ge.s32.totalorder %s3268_s9, 2 }
  0x2c   : > { %p2675_p9 = scmp.lt.s32.totalorder %s2881_s16, 6  ;;  %p3003_p10 = por %p54_p5, %p53_p4 }
  0x2d   : > { %s147_s23 = sand.u32 1, %s2861_s11   ;;  %s3270_s9 = smov (%p37_p8, %s3268_s9), 0 }
  0x2e   : > { %s2282_s24 = sshll.u32 %s147_s23, 2  ;;  %s39_s25 = ssub.s32 %s2877_s15, %s3270_s9 }
  0x2f   : > { %s41_s26 = sor.u32 %s40_s21, %s39_s25  ;;  %s2658_s27 = smul.u32 3, %s2877_s15 }
  0x30   : > { %p44_p7 = scmp.eq.s32.totalorder %s41_s26, 0  ;;  %s151_s28 = scalar_lea.vmem [#allocation2], %s2282_s24 }
  0x31   : > { %s161_s29 = sshll.u32 %s151_s28, 4  ;;  %s157_s30 = sadd.s32 %s2873_s14, %s2658_s27  ;;  %s3014_s29 = int_to_ptr.vmem [resolvable:$true] %s161_s29 }
  0x32   : > { %s3017_s3 = scalar_select %p44_p7, %s2861_s11, %s46_s17  }
  0x33   : > { %s2283_s4 = sshll.u32 %s157_s30, 6  ;;  %p3023_p11 = pnand %p2675_p9, %p3003_p10 }
  0x34   : > { %s3030_s21 = scalar_lea.hbm %s3241_s0, %s2283_s4  ;;  %s148_s17 = scalar_lea.sflag [#allocation3], %s147_s23 }
  0x35   : > { %s2781_s24 = scalar_lea.hbm %s3030_s21, 64  ;;  %p2783_p13 = pneg %p3023_p11 }
  0x36   : > { %p2782_p12 = scmp.ne.s32.totalorder %s3030_s21, %s2781_s24  ;;  %s2786_s26 = scalar_lea.hbm %s3241_s0, 384 }
  0x37   : > { %p2787_p3 = scmp.lt.u32.totalorder %s3030_s21, %s3241_s0  ;;  %p2788_p6 = scmp.lt.u32.totalorder %s2786_s26, %s2781_s24 }
  0x38   : > { %p2784_p0 = pnand %p2783_p13, %p2782_p12  ;;  %p2790_p4 = scmp.lt.u32.totalorder %s2781_s24, %s3030_s21 }
  0x39   : > { %p2789_p1 = por %p2788_p6, %p2787_p3 }
  0x3a   : > { %p2785_p2 = pneg %p2784_p0 }
  0x3b   : > { %p2791_p5 = por %p2790_p4, %p2789_p1 }
  0x3d   : > { %p2792_p8 = pnand %p2791_p5, %p2785_p2 }
  0x3f   : > { %2795 = shalt.err (!%p2792_p8)
}
  0x40   : > { %s2796_s23 = scalar_lea.vmem %s3014_s29, 64  ;;  %s2886_s30 = smov [#allocation2]  }
  0x41   : > { %p2797_p9 = scmp.ne.s32.totalorder %s3014_s29, %s2796_s23  ;;  %s2801_s4 = sshll.u32 %s2886_s30, 4  ;;  %s2802_s4 = int_to_ptr.vmem [resolvable:$false] %s2801_s4 }
  0x42   : > { %s2803_s6 = scalar_lea.vmem %s2802_s4, 128  ;;  %p2804_p12 = scmp.lt.s32.totalorder %s3014_s29, %s2802_s4 }
  0x43   : > { %p2799_p10 = pnand %p2797_p9, %p2783_p13  ;;  %p2805_p0 = scmp.lt.s32.totalorder %s2803_s6, %s2796_s23 }
  0x45   : > { %p2800_p7 = pneg %p2799_p10  ;;  %p2806_p3 = por %p2805_p0, %p2804_p12 }
  0x47   : > { %p2807_p6 = pnand %p2806_p3, %p2800_p7 }
  0x49   : > { %2810 = shalt.err (!%p2807_p6)
}
  0x4a   : > { %2673 = dma.hbm_to_vmem [thread:$0]  (!%p3023_p11), %s3030_s21, 64, %s3014_s29, %s148_s17  }
  0x4b   : > { %p3254_p2 = scmp.ne.s32.totalorder %s3250_s20, 0 }
  0x4c   : > { %s172_s7 = sand.u32 (!%p3254_p2), 1, %s2857_s10   ;;  %p3255_p13 = scmp.ne.s32.totalorder (!%p3254_p2), %s3249_s19, 0 }
  0x4d   : > { %170 = sbr.rel (%p3254_p2) target bundleno = 633 (0x279), region = 28  ;;  %s2285_s24 = sshll.u32 (!%p3254_p2), %s172_s7, 2 }
  0x4e   : > { %s173_s22 = scalar_lea.sflag (!%p3254_p2), [#allocation3], %s172_s7  ;;  %s176_s25 = scalar_lea.vmem (!%p3254_p2), [#allocation2], %s2285_s24 }
  0x54   : > { %2844 = dma.done.wait (%p3255_p13), %s173_s22, 64  }
  0x55   : > { %2846 = vsyncadd (%p3255_p13), %s173_s22, 4294967232  ;;  %p3256_p1 = scmp.ne.s32.totalorder %s3248_s18, 0 }
  0x57   : > { %2848 = dma.done.wait (%p3256_p1), [#allocation5], 256  }
  0x58   : > { %2850 = vsyncadd (%p3256_p1), [#allocation5], 4294967040  ;;  %v2887_v0 = vmov 0.0|0.0   ;;  %vm2888_vm0 = vmmov 0   ;;  %v2889_v1 = vmov 0.0   ;;  %vm223_vm1 = vcmask 130048  }
  0x59   : > { %2546 = vmatprep.subr.bf16.mxu0 %v2887_v0  ;;  %2564 = vmatprep.subr.bf16.mxu1 %v2887_v0  ;;  %v704_v2 = vld [vmem:[%s176_s25] sm:$0xf]  ;;  %s2890_s19 = smov 112   ;;  %s2891_s18 = smov 80   ;;  %v220_v4 = vld [vmem:[#allocation4] sm:$0xff]  ;;  %v221_v5 = vld [vmem:[#allocation4 + $0x8] sm:$0xff] }
  0x5a   : > { %2382 = vmatprep.mubr.msk.f32.mxu0 %vm2888_vm0, %v2889_v1  ;;  %2424 = vmatprep.mubr.msk.f32.mxu1 %vm2888_vm0, %v2889_v1  ;;  %v1670_v3 = vld [vmem:[%s176_s25] sm:$0xf]  ;;  %v228_v8 = vand.u32 4294901760, %v220_v4  ;;  %v231_v9 = vand.u32 4294901760, %v221_v5  ;;  %s2892_s20 = smov 96   ;;  %p208_p11 = scmp.lt.s32.totalorder %s2869_s13, 1 }
  0x5b   : > { %706 = vrot.lane.b32.xlu0 %v704_v2, %s2890_s19  ;;  %1672 = vrot.lane.b32.xlu1 %v1670_v3, %s2891_s18  ;;  %v222_v6 = vld [vmem:[%s176_s25] sm:$0xf]  ;;  %p210_p4 = scmp.lt.s32.totalorder %s2865_s12, 2  ;;  %vm686_vm2 = vcmask 27648   ;;  %s2893_s23 = smov 124  }
  0x5c   : > { %v1187_v7 = vld [vmem:[%s176_s25] sm:$0xf]  ;;  %v225_v10 = vsel %vm223_vm1, %v222_v6, 0  ;;  %v3075_v12 = vpack.c.bf16 %v231_v9, %v228_v8  ;;  %v306_v13 = vsub.f32 %v220_v4, %v228_v8  ;;  %v313_v14 = vsub.f32 %v221_v5, %v231_v9  ;;  %s3272_s13 = smov (!%p208_p11, %s2869_s13), 1 }
  0x5d   : > { %v294_v11 = vand.u32 4294901760, %v225_v10  ;;  %s3274_s12 = smov (!%p210_p4, %s2865_s12), 2  ;;  %s2659_s29 = smul.u32 48, %s3272_s13 }
  0x5e   : > { %2548 = vmatpush3.bf16.msra.mxu0 %v3075_v12  ;;  %v307_v16 = vand.u32 4294901760, %v306_v13  ;;  %v314_v17 = vand.u32 4294901760, %v313_v14  ;;  %2566 = vmatpush3.bf16.msra.mxu1 %v3075_v12  ;;  %v3087_v26 = vpack.c.bf16 %v313_v14, %v306_v13  ;;  %s2287_s5 = sshll.u32 %s3274_s12, 4  ;;  %s2894_s12 = smov 120  }
  0x5f   : > { %1189 = vrot.lane.b32.xlu0 %v1187_v7, %s2892_s20  ;;  %v295_v15 = vsub.f32 %v225_v10, %v294_v11  ;;  %2549 = vmatprep.subr.bf16.mxu0 %v2887_v0  ;;  %s217_s21 = sadd.s32 %s2659_s29, %s2287_s5  ;;  %s2895_s13 = smov 116  }
  0x60   : > { %2567 = vmatprep.subr.bf16.mxu1 %v2887_v0  ;;  %v308_v19 = vsub.f32 %v306_v13, %v307_v16  ;;  %v315_v20 = vsub.f32 %v313_v14, %v314_v17  ;;  %v3097_v27 = vpack.c.bf16 %v314_v17, %v307_v16  ;;  %s2288_s17 = sshll.u32 %s217_s21, 2 }
  0x61   : > { %v296_v18 = vand.u32 4294901760, %v295_v15  ;;  %s3183_s28 = scalar_lea.vmem %s3243_s2, %s2288_s17 }
  0x62   : > { %v309_v22 = vand.u32 4294901760, %v308_v19  ;;  %v316_v23 = vand.u32 4294901760, %v315_v20 }
  0x63   : > { %v297_v21 = vsub.f32 %v295_v15, %v296_v18 }
  0x64   : > { %v3081_v25 = vpack.c.bf16 %v316_v23, %v309_v22 }
  0x65   : > { %v298_v24 = vand.u32 4294901760, %v297_v21 }
  0x67   : > { %2383 = vmatmul.mubr.f32.vlgmr.msra.gmra.mrb[0].mxu0 %v298_v24 }
  0x68   : > { %2551 = vmatpush3.bf16.msra.mxu0 %v3081_v25  ;;  %2389 = vmatprep.mubr.msk.f32.mxu0 %vm2888_vm0, %v2889_v1 }
  0x69   : > { %2552 = vmatprep.subr.bf16.mxu0 %v2887_v0 }
  0x6f   : > { %2390 = vmatmul.mubr.f32.vlgmr.msra.gmra.mrb[0].mxu0 %v294_v11 }
  0x70   : > { %2554 = vmatpush3.bf16.msra.mxu0 %v3087_v26  ;;  %2396 = vmatprep.mubr.msk.f32.mxu0 %vm2888_vm0, %v2889_v1 }
  0x71   : > { %2555 = vmatprep.subr.bf16.mxu0 %v2887_v0 }
  0x77   : > { %2397 = vmatmul.mubr.f32.vlgmr.msra.gmra.mrb[0].mxu0 %v295_v15 }
  0x78   : > { %2557 = vmatpush3.bf16.msra.mxu0 %v3075_v12  ;;  %2403 = vmatprep.mubr.msk.f32.mxu0 %vm2888_vm0, %v2889_v1 }
  0x79   : > { %2558 = vmatprep.subr.bf16.mxu0 %v2887_v0 }
  0x7f   : > { %2404 = vmatmul.mubr.f32.vlgmr.msra.gmra.mrb[0].mxu0 %v296_v18 }
  0x80   : > { %2560 = vmatpush3.bf16.msra.mxu0 %v3097_v27  ;;  %2410 = vmatprep.mubr.msk.f32.mxu0 %vm2888_vm0, %v2889_v1 }
  0x81   : > { %2561 = vmatprep.subr.bf16.mxu0 %v2887_v0 }
  0x87   : > { %2411 = vmatmul.mubr.f32.vlgmr.msra.gmra.mrb[0].mxu0 %v294_v11 }
  0x88   : > { %2563 = vmatpush3.bf16.msra.mxu0 %v3075_v12  ;;  %2417 = vmatprep.mubr.msk.f32.mxu0 %vm2888_vm0, %v2889_v1 }
  0x89   : > { %2582 = vmatprep.subr.bf16.mxu0 %v2887_v0 }
  0x8f   : > { %2418 = vmatmul.mubr.f32.vlgmr.msra.gmra.mrb[0].mxu0 %v294_v11 }
  0x90   : > { %2584 = vmatpush3.bf16.msra.mxu0 %v3075_v12  ;;  %2466 = vmatprep.mubr.msk.f32.mxu0 %vm2888_vm0, %v2889_v1 }
  0x91   : > { %2585 = vmatprep.subr.bf16.mxu0 %v2887_v0 }
  0xcd   : > { %v707_v28 = vpop.permute.xlu0 %706  ;;  %v1673_v42 = vpop.permute.xlu1 %1672 }
  0xce   : > { %v708_v29 = vsel %vm223_vm1, %v707_v28, 0  ;;  %v1674_v43 = vsel %vm223_vm1, %v1673_v42, 0 }
  0xcf   : > { %v777_v30 = vand.u32 4294901760, %v708_v29  ;;  %v1743_v44 = vand.u32 4294901760, %v1674_v43 }
  0xd1   : > { %v778_v31 = vsub.f32 %v708_v29, %v777_v30  ;;  %v1190_v32 = vpop.permute.xlu0 %1189  ;;  %v1744_v45 = vsub.f32 %v1674_v43, %v1743_v44 }
  0xd2   : > { %v1191_v33 = vsel %vm223_vm1, %v1190_v32, 0 }
  0xd3   : > { %v779_v34 = vand.u32 4294901760, %v778_v31  ;;  %v1260_v35 = vand.u32 4294901760, %v1191_v33  ;;  %v1745_v46 = vand.u32 4294901760, %v1744_v45 }
  0xd5   : > { %v1261_v36 = vsub.f32 %v1191_v33, %v1260_v35  ;;  %v780_v37 = vsub.f32 %v778_v31, %v779_v34  ;;  %v1746_v47 = vsub.f32 %v1744_v45, %v1745_v46 }
  0xd7   : > { %v1262_v38 = vand.u32 4294901760, %v1261_v36  ;;  %v781_v39 = vand.u32 4294901760, %v780_v37  ;;  %v1747_v48 = vand.u32 4294901760, %v1746_v47 }
  0xd9   : > { %v1263_v40 = vsub.f32 %v1261_v36, %v1262_v38  ;;  %2425 = vmatmul.mubr.f32.vlgmr.msra.gmra.mrb[0].mxu1 %v781_v39 }
  0xda   : > { %2569 = vmatpush3.bf16.msra.mxu1 %v3081_v25  ;;  %2431 = vmatprep.mubr.msk.f32.mxu1 %vm2888_vm0, %v2889_v1 }
  0xdb   : > { %v1264_v41 = vand.u32 4294901760, %v1263_v40  ;;  %2570 = vmatprep.subr.bf16.mxu1 %v2887_v0 }
  0xdd   : > { %2467 = vmatmul.mubr.f32.vlgmr.msra.gmra.mrb[2].mxu0 %v1264_v41 }
  0xde   : > { %2587 = vmatpush3.bf16.msra.mxu0 %v3081_v25  ;;  %2473 = vmatprep.mubr.msk.f32.mxu0 %vm2888_vm0, %v2889_v1 }
  0xdf   : > { %2588 = vmatprep.subr.bf16.mxu0 %v2887_v0 }
  0xe1   : > { %2432 = vmatmul.mubr.f32.vlgmr.msra.gmra.mrb[0].mxu1 %v777_v30 }
  0xe2   : > { %2572 = vmatpush3.bf16.msra.mxu1 %v3087_v26  ;;  %2438 = vmatprep.mubr.msk.f32.mxu1 %vm2888_vm0, %v2889_v1 }
  0xe3   : > { %2573 = vmatprep.subr.bf16.mxu1 %v2887_v0 }
  0xe5   : > { %2474 = vmatmul.mubr.f32.vlgmr.msra.gmra.mrb[2].mxu0 %v1260_v35 }
  0xe6   : > { %2590 = vmatpush3.bf16.msra.mxu0 %v3087_v26  ;;  %2480 = vmatprep.mubr.msk.f32.mxu0 %vm2888_vm0, %v2889_v1 }
  0xe7   : > { %2591 = vmatprep.subr.bf16.mxu0 %v2887_v0 }
  0xe9   : > { %2439 = vmatmul.mubr.f32.vlgmr.msra.gmra.mrb[0].mxu1 %v778_v31 }
  0xea   : > { %2575 = vmatpush3.bf16.msra.mxu1 %v3075_v12  ;;  %2445 = vmatprep.mubr.msk.f32.mxu1 %vm2888_vm0, %v2889_v1 }
  0xeb   : > { %2576 = vmatprep.subr.bf16.mxu1 %v2887_v0 }
  0xed   : > { %2481 = vmatmul.mubr.f32.vlgmr.msra.gmra.mrb[2].mxu0 %v1261_v36 }
  0xee   : > { %2593 = vmatpush3.bf16.msra.mxu0 %v3075_v12  ;;  %2487 = vmatprep.mubr.msk.f32.mxu0 %vm2888_vm0, %v2889_v1 }
  0xef   : > { %2594 = vmatprep.subr.bf16.mxu0 %v2887_v0 }
  0xf1   : > { %2446 = vmatmul.mubr.f32.vlgmr.msra.gmra.mrb[0].mxu1 %v779_v34 }
  0xf2   : > { %2578 = vmatpush3.bf16.msra.mxu1 %v3097_v27  ;;  %2452 = vmatprep.mubr.msk.f32.mxu1 %vm2888_vm0, %v2889_v1 }
  0xf3   : > { %2579 = vmatprep.subr.bf16.mxu1 %v2887_v0 }
  0xf5   : > { %2488 = vmatmul.mubr.f32.vlgmr.msra.gmra.mrb[2].mxu0 %v1262_v38 }
  0xf6   : > { %2596 = vmatpush3.bf16.msra.mxu0 %v3097_v27  ;;  %2494 = vmatprep.mubr.msk.f32.mxu0 %vm2888_vm0, %v2889_v1 }
  0xf7   : > { %2597 = vmatprep.subr.bf16.mxu0 %v2887_v0 }
  0xf9   : > { %2453 = vmatmul.mubr.f32.vlgmr.msra.gmra.mrb[0].mxu1 %v777_v30 }
  0xfa   : > { %2581 = vmatpush3.bf16.msra.mxu1 %v3075_v12  ;;  %2459 = vmatprep.mubr.msk.f32.mxu1 %vm2888_vm0, %v2889_v1 }
  0xfb   : > { %2600 = vmatprep.subr.bf16.mxu1 %v2887_v0 }
  0xfd   : > { %2495 = vmatmul.mubr.f32.vlgmr.msra.gmra.mrb[2].mxu0 %v1260_v35 }
  0xfe   : > { %2599 = vmatpush3.bf16.msra.mxu0 %v3075_v12  ;;  %2501 = vmatprep.mubr.msk.f32.mxu0 %vm2888_vm0, %v2889_v1 }
 0x101   : > { %2460 = vmatmul.mubr.f32.vlgmr.msra.gmra.mrb[0].mxu1 %v777_v30 }
 0x102   : > { %2602 = vmatpush3.bf16.msra.mxu1 %v3075_v12  ;;  %2508 = vmatprep.mubr.msk.f32.mxu1 %vm2888_vm0, %v2889_v1 }
 0x103   : > { %2603 = vmatprep.subr.bf16.mxu1 %v2887_v0 }
 0x105   : > { %2502 = vmatmul.mubr.f32.vlgmr.msra.gmra.mrb[2].mxu0 %v1260_v35  ;;  %2509 = vmatmul.mubr.f32.vlgmr.msra.gmra.mrb[2].mxu1 %v1747_v48 }
 0x106   : > { %2605 = vmatpush3.bf16.msra.mxu1 %v3081_v25  ;;  %2515 = vmatprep.mubr.msk.f32.mxu1 %vm2888_vm0, %v2889_v1 }
 0x107   : > { %2606 = vmatprep.subr.bf16.mxu1 %v2887_v0 }
 0x10d   : > { %2516 = vmatmul.mubr.f32.vlgmr.msra.gmra.mrb[2].mxu1 %v1743_v44 }
 0x10e   : > { %2608 = vmatpush3.bf16.msra.mxu1 %v3087_v26  ;;  %2522 = vmatprep.mubr.msk.f32.mxu1 %vm2888_vm0, %v2889_v1 }
 0x10f   : > { %2609 = vmatprep.subr.bf16.mxu1 %v2887_v0 }
 0x115   : > { %2523 = vmatmul.mubr.f32.vlgmr.msra.gmra.mrb[2].mxu1 %v1744_v45 }
 0x116   : > { %2611 = vmatpush3.bf16.msra.mxu1 %v3075_v12  ;;  %2529 = vmatprep.mubr.msk.f32.mxu1 %vm2888_vm0, %v2889_v1 }
 0x117   : > { %2612 = vmatprep.subr.bf16.mxu1 %v2887_v0 }
 0x11d   : > { %2530 = vmatmul.mubr.f32.vlgmr.msra.gmra.mrb[2].mxu1 %v1745_v46 }
 0x11e   : > { %2614 = vmatpush3.bf16.msra.mxu1 %v3097_v27  ;;  %2536 = vmatprep.mubr.msk.f32.mxu1 %vm2888_vm0, %v2889_v1 }
 0x11f   : > { %2615 = vmatprep.subr.bf16.mxu1 %v2887_v0 }
 0x125   : > { %2537 = vmatmul.mubr.f32.vlgmr.msra.gmra.mrb[2].mxu1 %v1743_v44 }
 0x126   : > { %2617 = vmatpush3.bf16.msra.mxu1 %v3075_v12  ;;  %2543 = vmatprep.mubr.msk.f32.mxu1 %vm2888_vm0, %v2889_v1 }
 0x12d   : > { %2544 = vmatmul.mubr.f32.vlgmr.msra.gmra.mrb[2].mxu1 %v1743_v44 }
 0x162   : > { %v682_v49 = vpop.f32.mrb[0].mxu0 }
 0x163   : > { %687 = vst.msk [vmem:[%s3183_s28] sm:$0xf] %vm686_vm2, %v682_v49  ;;  %689 = vrot.lane.b32.xlu1 %v682_v49, %s2893_s23  ;;  %v2419_v50 = vpop.f32.mrb[1].mxu0  ;;  %694 = vrot.lane.b32.xlu0 %v682_v49, %s2894_s12 }
 0x167   : > { %699 = vrot.lane.b32.xlu1 %v682_v49, %s2895_s13 }
 0x1d4   : > { %v1165_v51 = vpop.f32.mrb[0].mxu1 }
 0x1d5   : > { %2292 = vst.msk [vmem:[%s3183_s28 + $0x20] sm:$0xf] %vm686_vm2, %v1165_v51  ;;  %v2461_v52 = vpop.f32.mrb[1].mxu1  ;;  %1172 = vrot.lane.b32.xlu0 %v1165_v51, %s2893_s23  ;;  %1177 = vrot.lane.b32.xlu1 %v1165_v51, %s2894_s12  ;;  %v690_v53 = vpop.permute.xlu1 %689 }
 0x1d6   : > { %2289 = vst.msk [vmem:[%s3183_s28 + $0x10] sm:$0xf] %vm686_vm2, %v690_v53  ;;  %v695_v54 = vpop.permute.xlu0 %694 }
 0x1d7   : > { %2290 = vst.msk [vmem:[%s3183_s28 + $0x4] sm:$0xf] %vm686_vm2, %v695_v54 }
 0x1d8   : > { %v1648_v55 = vpop.f32.mrb[2].mxu0 }
 0x1d9   : > { %2296 = vst.msk [vmem:[%s3183_s28 + $0x8] sm:$0xf] %vm686_vm2, %v1648_v55  ;;  %1182 = vrot.lane.b32.xlu0 %v1165_v51, %s2895_s13  ;;  %1655 = vrot.lane.b32.xlu1 %v1648_v55, %s2893_s23  ;;  %v2503_v56 = vpop.f32.mrb[3].mxu0  ;;  %v700_v57 = vpop.permute.xlu1 %699 }
 0x1da   : > { %2291 = vst.msk [vmem:[%s3183_s28 + $0x14] sm:$0xf] %vm686_vm2, %v700_v57 }
 0x1dd   : > { %1660 = vrot.lane.b32.xlu0 %v1648_v55, %s2894_s12  ;;  %1665 = vrot.lane.b32.xlu1 %v1648_v55, %s2895_s13 }
 0x200   : > { %v2131_v58 = vpop.f32.mrb[2].mxu1 }
 0x201   : > { %2300 = vst.msk [vmem:[%s3183_s28 + $0x28] sm:$0xf] %vm686_vm2, %v2131_v58  ;;  %v2545_v59 = vpop.f32.mrb[3].mxu1  ;;  %2138 = vrot.lane.b32.xlu0 %v2131_v58, %s2893_s23  ;;  %2143 = vrot.lane.b32.xlu1 %v2131_v58, %s2894_s12 }
 0x205   : > { %2148 = vrot.lane.b32.xlu0 %v2131_v58, %s2895_s13 }
 0x247   : > { %v1173_v60 = vpop.permute.xlu0 %1172  ;;  %v1178_v61 = vpop.permute.xlu1 %1177 }
 0x248   : > { %2293 = vst.msk [vmem:[%s3183_s28 + $0x30] sm:$0xf] %vm686_vm2, %v1173_v60  ;;  %2294 = vst.msk [vmem:[%s3183_s28 + $0x24] sm:$0xf] %vm686_vm2, %v1178_v61 }
 0x24b   : > { %v1183_v62 = vpop.permute.xlu0 %1182  ;;  %v1656_v63 = vpop.permute.xlu1 %1655 }
 0x24c   : > { %2295 = vst.msk [vmem:[%s3183_s28 + $0x34] sm:$0xf] %vm686_vm2, %v1183_v62  ;;  %2297 = vst.msk [vmem:[%s3183_s28 + $0x18] sm:$0xf] %vm686_vm2, %v1656_v63 }
 0x24f   : > { %v1661_v0 = vpop.permute.xlu0 %1660  ;;  %v1666_v1 = vpop.permute.xlu1 %1665 }
 0x250   : > { %2298 = vst.msk [vmem:[%s3183_s28 + $0xc] sm:$0xf] %vm686_vm2, %v1661_v0  ;;  %2299 = vst.msk [vmem:[%s3183_s28 + $0x1c] sm:$0xf] %vm686_vm2, %v1666_v1 }
 0x273   : > { %v2139_v2 = vpop.permute.xlu0 %2138  ;;  %v2144_v3 = vpop.permute.xlu1 %2143 }
 0x274   : > { %2301 = vst.msk [vmem:[%s3183_s28 + $0x38] sm:$0xf] %vm686_vm2, %v2139_v2  ;;  %2302 = vst.msk [vmem:[%s3183_s28 + $0x2c] sm:$0xf] %vm686_vm2, %v2144_v3 }
 0x277   : > { %v2149_v4 = vpop.permute.xlu0 %2148 }
 0x278   : > { %2303 = vst.msk [vmem:[%s3183_s28 + $0x3c] sm:$0xf] %vm686_vm2, %v2149_v4 }
 0x279 PF: > { %s16_s16 = sadd.s32 1, %s2881_s16   ;;  %s3257_s30 = smov %s3270_s9 }
 0x27a   : > { %p13_p5 = scmp.ge.s32.totalorder %s16_s16, 8   ;;  %s3258_s9 = smov %s2857_s10 }
 0x27b   : > { %s3259_s10 = smov %s2861_s11  ;;  %s3260_s11 = smov %s3017_s3 }
 0x27c   : > { %s3261_s12 = smov %s2873_s14  ;;  %s3262_s13 = smov %s2877_s15 }
 0x27d   : > { %s3263_s14 = smov %s3266_s8  ;;  %s3264_s15 = smov %s3257_s30 }
 0x27e   :  { %15 = sbr.rel (!%p13_p5) target bundleno = 6 (0x6), region = 87 }
 0x285   :  { %2188 = vsyncpa [#allocation3], 1 }
 0x286   :  { %2190 = vsyncpa [#allocation3 + $0x1], 1 }
 0x287   :  { %2191 = vsyncpa [#allocation5], 1 }

</bundles_post_ra>
